<compile_context>
chip_gen: v5e
topology: v5e:2x2
jax: 0.10.0
libtpu: 0.0.40
codegen_flags: <defaults>
</compile_context>

<pallas_src>
import functools
from math import factorial, sqrt

import numpy as np
import jax
import jax.numpy as jnp
from jax.experimental import pallas as pl
from jax.experimental.pallas import tpu as pltpu


# MXU operand dtype: jnp.bfloat16 recommended on v6e/v7x (keep f32 accumulation via
# preferred_element_type); default f32 so the folded CG+weight matrix keeps full
# precision and the numpy reference check below stays tight.
MXU_DTYPE = jnp.float32
# Explicit scoped-VMEM budget (<= physical VMEM on v5e/v6e: 128 MiB, v7x: 64 MiB).
VMEM_LIMIT_BYTES = 32 * 1024 * 1024
LANES = 128


# ----------------------------- Clebsch-Gordan coefficients -------------------
def clebsch_gordan(j1, m1, j2, m2, j, m):
    if m1 + m2 != m or j < abs(j1 - j2) or j > j1 + j2:
        return 0.0
    pref = sqrt((2 * j + 1) * factorial(j + j1 - j2) * factorial(j - j1 + j2)
                * factorial(j1 + j2 - j) / factorial(j1 + j2 + j + 1))
    pref *= sqrt(factorial(j + m) * factorial(j - m) * factorial(j1 - m1)
                 * factorial(j1 + m1) * factorial(j2 - m2) * factorial(j2 + m2))
    kmin = max(0, j2 - j - m1, j1 + m2 - j)
    kmax = min(j1 + j2 - j, j1 - m1, j2 + m2)
    s = 0.0
    for k in range(kmin, kmax + 1):
        s += (-1.0) ** k / (factorial(k) * factorial(j1 + j2 - j - k)
                            * factorial(j1 - m1 - k) * factorial(j2 + m2 - k)
                            * factorial(j - j2 + m1 + k) * factorial(j - j1 - m2 + k))
    return pref * s


def cg_matrix(l1, l2, l):
    """C[i1, i2, im] with i = m + l indexing, i.e. m runs -l..l."""
    C = np.zeros((2 * l1 + 1, 2 * l2 + 1, 2 * l + 1), dtype=np.float64)
    for i1 in range(2 * l1 + 1):
        for i2 in range(2 * l2 + 1):
            m1, m2 = i1 - l1, i2 - l2
            m = m1 + m2
            if -l <= m <= l:
                C[i1, i2, m + l] = clebsch_gordan(l1, m1, l2, m2, l, m)
    return C


def cg_tau(tau1, tau2, max_l):
    out = [0] * (max_l + 1)
    for l in range(max_l + 1):
        for l1 in range(max_l + 1):
            for l2 in range(max_l + 1):
                if abs(l1 - l2) <= l <= l1 + l2:
                    out[l] += tau1[l1] * tau2[l2]
    return out


# ----------------------------- layout helpers ---------------------------------
def so3_widths(taus, max_l):
    w = [(2 * l + 1) * taus[l] for l in range(max_l + 1)]
    off = np.concatenate([[0], np.cumsum(w)]).astype(int)
    return int(off[-1]), off


def parts_to_feat(parts, max_l):
    """dict l -> (real (P,M,T), imag (P,M,T))  ->  (P, 2F) matrix [real | imag]."""
    reals, imags = [], []
    P = parts[0][0].shape[0]
    for l in range(max_l + 1):
        xr, xi = parts[l]
        M, T = xr.shape[1], xr.shape[2]
        reals.append(xr.reshape(P, M * T))
        imags.append(xi.reshape(P, M * T))
    return jnp.concatenate(reals + imags, axis=1)


def feat_to_parts(feat, taus, max_l):
    """(P, 2F) matrix [real | imag]  ->  dict l -> (real (P,M,T), imag (P,M,T))."""
    F, off = so3_widths(taus, max_l)
    P = feat.shape[0]
    out = {}
    for l in range(max_l + 1):
        M, T = 2 * l + 1, taus[l]
        r = feat[:, off[l]:off[l + 1]].reshape(P, M, T)
        i = feat[:, F + off[l]:F + off[l + 1]].reshape(P, M, T)
        out[l] = (r, i)
    return out


def _pad_lanes(c):
    return ((c + LANES - 1) // LANES) * LANES


def _pick_group(f_small, f_big):
    """# of broadcast columns fused into one MXU K-chunk (aim K-chunk ~= 128)."""
    g = max(1, LANES // (2 * f_big))
    return max(1, min(g, f_small))


# --------------------- CG structure folded with the mix weights ---------------
def cg_structure(tau_x, tau_y, l, max_l):
    """S[alpha, beta, im, c_out]: CGproduct structure constants mapping the outer
    product of two flattened SO3 feature vectors onto output degree l, with the
    channel order c_out = blockoff(l1,l2) + c1*tau_y[l2] + c2 (l1 outer loop)."""
    Fx, offx = so3_widths(tau_x, max_l)
    Fy, offy = so3_widths(tau_y, max_l)
    tcg = cg_tau(tau_x, tau_y, max_l)[l]
    M = 2 * l + 1
    S = np.zeros((Fx, Fy, M, tcg), dtype=np.float64)
    cout_off = 0
    for l1 in range(max_l + 1):
        T1 = tau_x[l1]
        for l2 in range(max_l + 1):
            T2 = tau_y[l2]
            if not (abs(l1 - l2) <= l <= l1 + l2):
                continue
            C = cg_matrix(l1, l2, l)
            for i1 in range(2 * l1 + 1):
                for i2 in range(2 * l2 + 1):
                    for im in range(M):
                        c = C[i1, i2, im]
                        if c == 0.0:
                            continue
                        ax = offx[l1] + i1 * T1
                        bx = offy[l2] + i2 * T2
                        for c1 in range(T1):
                            for c2 in range(T2):
                                S[ax + c1, bx + c2, im, cout_off + c1 * T2 + c2] = c
            cout_off += T1 * T2
    return S


def fold_cg_weights(tau_x, tau_y, weights, max_l, *, loop_side, out_cols):
    """Fold CG structure constants with the complex channel-mix weights into the
    row-blocked real matrix consumed by _cg_chunk_matmul.

    loop_side: which operand's columns the kernel broadcasts one at a time
      'x' -> kernel loops over alpha (x columns); big side is y
      'y' -> kernel loops over beta  (y columns); big side is x
    Row order: for each loop index j, F_big rows hit by z_r = Re(big * col_j)
    ([B_r | B_i | 0]) then F_big rows hit by z_i ([-B_i | B_r | 0]).
    Columns are zero-padded to out_cols (multiple of 128 -> lane-dense output).
    """
    Fx, _ = so3_widths(tau_x, max_l)
    Fy, _ = so3_widths(tau_y, max_l)
    br_blocks, bi_blocks = [], []
    for l in range(max_l + 1):
        S = cg_structure(tau_x, tau_y, l, max_l).reshape(Fx * Fy, 2 * l + 1, -1)
        wr = np.asarray(weights[l][0], np.float64)
        wi = np.asarray(weights[l][1], np.float64)
        tout = wr.shape[1]
        br_blocks.append(np.einsum('gmc,ct->gmt', S, wr).reshape(Fx * Fy, (2 * l + 1) * tout))
        bi_blocks.append(np.einsum('gmc,ct->gmt', S, wi).reshape(Fx * Fy, (2 * l + 1) * tout))
    Br = np.concatenate(br_blocks, axis=1).reshape(Fx, Fy, -1)     # (Fx, Fy, Fout)
    Bi = np.concatenate(bi_blocks, axis=1).reshape(Fx, Fy, -1)
    if loop_side == 'y':
        Br = Br.transpose(1, 0, 2)                                 # (Fy, Fx, Fout)
        Bi = Bi.transpose(1, 0, 2)
    f_loop, f_big, f_out = Br.shape
    pad = out_cols - 2 * f_out
    assert pad >= 0
    z = np.zeros((f_loop, f_big, pad))
    blk_r = np.concatenate([Br, Bi, z], axis=2)    # rows hit by z_r
    blk_i = np.concatenate([-Bi, Br, z], axis=2)   # rows hit by z_i
    stacked = np.concatenate([blk_r, blk_i], axis=1)               # (f_loop, 2*f_big, cols)
    return jnp.asarray(stacked.reshape(f_loop * 2 * f_big, out_cols), dtype=MXU_DTYPE)


# ----------------------------- in-kernel contraction ---------------------------
def _cg_chunk_matmul(sr, si, br, bi, w_ref, group, acc):
    """Chunked complex CG contraction; never materializes the full outer-product slab.

    sr/si (R, F_small): operand whose columns are broadcast one at a time
    br/bi (R, F_big)  : the other operand, used full-width per step
    w_ref (F_small*2*F_big, NOUT): folded CG+weight blocks (see fold_cg_weights)
    group : broadcast columns fused per MXU K-chunk (K-chunk = group*2*F_big ~ 128)
    """
    f_small = sr.shape[1]
    f_big = br.shape[1]
    for j0 in range(0, f_small, group):
        g = min(group, f_small - j0)
        pieces = []
        for j in range(j0, j0 + g):
            cr = sr[:, j:j + 1]
            ci = si[:, j:j + 1]
            pieces.append(br * cr - bi * ci)        # z_r  (R, F_big)
            pieces.append(br * ci + bi * cr)        # z_i  (R, F_big)
        u = jnp.concatenate(pieces, axis=1)         # (R, g*2*F_big) ~ 128 lanes
        wblk = w_ref[j0 * 2 * f_big:(j0 + g) * 2 * f_big, :]
        acc = acc + jnp.dot(u.astype(MXU_DTYPE), wblk,
                            preferred_element_type=jnp.float32)
    return acc


# ----------------------------- Pallas kernels ---------------------------------
def _nl_kernel(f_in, group, adj_ref, vfeat_ref, b_ref, o_ref):
    # fused: message passing + CGproduct(mp, mp) for all output l + weights_nl mix.
    # adjacency is real and features are packed [real | imag], so one real matmul
    # message-passes both components at once.
    mp = jnp.dot(adj_ref[...].astype(MXU_DTYPE), vfeat_ref[...].astype(MXU_DTYPE),
                 preferred_element_type=jnp.float32)
    xr = mp[:, :f_in]
    xi = mp[:, f_in:2 * f_in]
    acc = jnp.zeros(o_ref.shape, jnp.float32)
    o_ref[...] = _cg_chunk_matmul(xr, xi, xr, xi, b_ref, group, acc)


def _rel_kernel(f_x, f_y, f_out, n_rep, a0_tile, group, l_cols,
                x_ref, y_ref, b_ref, o_ref):
    t = pl.program_id(0)

    @pl.when(t == 0)
    def _init():
        o_ref[...] = jnp.zeros(o_ref.shape, jnp.float32)

    x = x_ref[...]                                  # (a0_tile, x_cols) lane-padded
    y = y_ref[...]                                  # (a0_tile*n, 2*f_y)
    yr, yi = y[:, :f_y], y[:, f_y:2 * f_y]

    # fused "repeat over pair adims": pair row p = a0*n + a1 uses x row a0.
    rows = a0_tile * n_rep
    xr_rep = jnp.concatenate(
        [jnp.broadcast_to(x[a:a + 1, :f_x], (n_rep, f_x)) for a in range(a0_tile)], axis=0)
    xi_rep = jnp.concatenate(
        [jnp.broadcast_to(x[a:a + 1, f_x:2 * f_x], (n_rep, f_x)) for a in range(a0_tile)], axis=0)

    # CGproduct(., sph) + weights_rel mix for ALL a0 of this tile in one stacked matmul.
    contrib = _cg_chunk_matmul(yr, yi, xr_rep, xi_rep, b_ref, group,
                               jnp.zeros((rows, o_ref.shape[1]), jnp.float32))

    # sum over the a0 atoms of this tile (rows are a0-major), accumulate over tiles.
    part = contrib[0:n_rep, :]
    for a in range(1, a0_tile):
        part = part + contrib[a * n_rep:(a + 1) * n_rep, :]
    o_ref[...] += part

    # last tile: the sum over a0 is complete -> complex NormalizeVecArr per output l
    # (divide each l block by its complex total sum, exactly like torch `/= sum`).
    @pl.when(t == pl.num_programs(0) - 1)
    def _finalize():
        for (c0, w) in l_cols:
            ar = o_ref[:, c0:c0 + w]
            ai = o_ref[:, f_out + c0:f_out + c0 + w]
            sr = jnp.sum(ar, keepdims=True)                        # (1, 1)
            si = jnp.sum(ai, keepdims=True)
            denom = sr * sr + si * si
            # TODO(synk): no epsilon, to match the reference `reps.parts[l] /= sum` exactly.
            o_ref[:, c0:c0 + w] = (ar * sr + ai * si) / denom
            o_ref[:, f_out + c0:f_out + c0 + w] = (ai * sr - ar * si) / denom


# ----------------------------- pallas_call wrappers ----------------------------
def cg_nl_mix(adj, vfeat, bstack, f_in, out_cols, group, row_tile=None):
    """kernel 1: adjacency matmul + CG(mp, mp) + weights_nl, tiled over atom rows."""
    n = adj.shape[0]
    if row_tile is None:
        row_tile = n if n <= 512 else 512
    row_tile = min(row_tile, n)
    if n % row_tile:
        row_tile = n
    kern = functools.partial(_nl_kernel, f_in, group)
    return pl.pallas_call(
        kern,
        out_shape=jax.ShapeDtypeStruct((n, out_cols), jnp.float32),
        grid=(n // row_tile,),
        in_specs=[pl.BlockSpec((row_tile, n), lambda i: (i, 0)),
                  # TODO(synk): for very large N add a K (source-atom) grid axis
                  # ("arbitrary") with an accumulator instead of a resident vfeat block.
                  pl.BlockSpec((n, vfeat.shape[1]), lambda i: (0, 0)),
                  pl.BlockSpec(bstack.shape, lambda i: (0, 0))],
        out_specs=pl.BlockSpec((row_tile, out_cols), lambda i: (i, 0)),
        compiler_params=pltpu.CompilerParams(
            dimension_semantics=("parallel",),
            vmem_limit_bytes=VMEM_LIMIT_BYTES),
    )(adj, vfeat, bstack)


def cg_rel_mix_sum_normalize(xfeat, sph_feat, bstack, f_x, f_y, f_out, out_cols,
                             l_cols, a0_tile, group):
    """kernel 2: pair repeat + CG(., sph) + weights_rel + sum over a0 + normalize."""
    n = xfeat.shape[0]
    assert sph_feat.shape[0] == n * n
    assert n % a0_tile == 0
    kern = functools.partial(_rel_kernel, f_x, f_y, f_out, n, a0_tile, group,
                             tuple(l_cols))
    return pl.pallas_call(
        kern,
        out_shape=jax.ShapeDtypeStruct((n, out_cols), jnp.float32),
        grid=(n // a0_tile,),                               # blocked a0 reduction
        in_specs=[pl.BlockSpec((a0_tile, xfeat.shape[1]), lambda t: (t, 0)),
                  pl.BlockSpec((a0_tile * n, sph_feat.shape[1]), lambda t: (t, 0)),
                  pl.BlockSpec(bstack.shape, lambda t: (0, 0))],
        out_specs=pl.BlockSpec((n, out_cols), lambda t: (0, 0)),   # resident accum
        compiler_params=pltpu.CompilerParams(
            dimension_semantics=("arbitrary",),
            vmem_limit_bytes=VMEM_LIMIT_BYTES),
    )(xfeat, sph_feat, bstack)


# ----------------------------- CGLayer forward --------------------------------
def cg_layer_forward(vertex_parts, conn, sph_parts, weights_nl, weights_rel, max_l,
                     *, a0_tile=8, row_tile=None):
    tau_v = [vertex_parts[l][0].shape[2] for l in range(max_l + 1)]
    tau_sph = [sph_parts[l][0].shape[2] for l in range(max_l + 1)]
    tau_mid = [weights_nl[l][0].shape[1] for l in range(max_l + 1)]
    tau_out = [weights_rel[l][0].shape[1] for l in range(max_l + 1)]

    f_v, _ = so3_widths(tau_v, max_l)
    f_mid, _ = so3_widths(tau_mid, max_l)
    f_sph, _ = so3_widths(tau_sph, max_l)
    f_out, off_out = so3_widths(tau_out, max_l)
    n = conn.shape[0]

    # layout glue (XLA, tiny, once): pack parts into flat [real | imag] matrices
    vfeat = parts_to_feat(vertex_parts, max_l)               # (N,   2*f_v)
    sph_feat = parts_to_feat(sph_parts, max_l)               # (N*N, 2*f_sph)

    # lane-dense output widths (padding columns of B are zero)
    nl_cols = _pad_lanes(2 * f_mid)
    rel_cols = _pad_lanes(2 * f_out)

    # fold CG coefficients + complex mix weights (tiny, host-side, f64->f32)
    b_nl = fold_cg_weights(tau_v, tau_v, weights_nl, max_l,
                           loop_side='x', out_cols=nl_cols)
    b_rel = fold_cg_weights(tau_mid, tau_sph, weights_rel, max_l,
                            loop_side='y', out_cols=rel_cols)   # loop over narrow sph side

    group_nl = _pick_group(f_v, f_v)
    group_rel = _pick_group(f_sph, f_mid)

    # kernel 1: message pass + CGproduct(mp, mp) + weights_nl  (all output l fused)
    mixed_nl = cg_nl_mix(conn, vfeat, b_nl, f_v, nl_cols, group_nl, row_tile=row_tile)

    # kernel 2: repeat over pairs + CGproduct(., sph) + weights_rel
    #           + blocked sum over a0 (resident accumulator) + complex normalization
    a0_tile = max(1, min(a0_tile, n))
    while n % a0_tile:
        a0_tile -= 1
    l_cols = tuple((int(off_out[l]), int(off_out[l + 1] - off_out[l]))
                   for l in range(max_l + 1))
    out_feat = cg_rel_mix_sum_normalize(mixed_nl, sph_feat, b_rel,
                                        f_mid, f_sph, f_out, rel_cols,
                                        l_cols, a0_tile, group_rel)

    out = feat_to_parts(out_feat[:, :2 * f_out], tau_out, max_l)
    for l in range(max_l + 1):
        assert out[l][0].shape[0] == vertex_parts[l][0].shape[0]   # adims preserved
    return out


# ----------------------------- numpy (float64) reference ----------------------
def _np_cplx(parts, max_l):
    return {l: np.asarray(parts[l][0], np.float64) + 1j * np.asarray(parts[l][1], np.float64)
            for l in range(max_l + 1)}


def _np_cgproduct(x, y, max_l):
    P = x[0].shape[0]
    out = {}
    for l in range(max_l + 1):
        blocks = []
        for l1 in range(max_l + 1):
            for l2 in range(max_l + 1):
                if abs(l1 - l2) <= l <= l1 + l2:
                    C = cg_matrix(l1, l2, l)
                    blk = np.einsum('pia,pjb,ijm->pmab', x[l1], y[l2], C)
                    blocks.append(blk.reshape(P, 2 * l + 1, -1))
        out[l] = np.concatenate(blocks, axis=2)
    return out


def reference_forward(vertex_parts, conn, sph_parts, weights_nl, weights_rel, max_l):
    n = conn.shape[0]
    conn_np = np.asarray(conn, np.float64)
    v = _np_cplx(vertex_parts, max_l)
    sph = _np_cplx(sph_parts, max_l)
    w_nl = {l: np.asarray(weights_nl[l][0], np.float64)
            + 1j * np.asarray(weights_nl[l][1], np.float64) for l in range(max_l + 1)}
    w_rel = {l: np.asarray(weights_rel[l][0], np.float64)
             + 1j * np.asarray(weights_rel[l][1], np.float64) for l in range(max_l + 1)}
    mp = {l: np.einsum('ab,bmt->amt', conn_np, v[l]) for l in range(max_l + 1)}
    cg_nl = _np_cgproduct(mp, mp, max_l)
    mixed_nl = {l: np.einsum('pmc,ct->pmt', cg_nl[l], w_nl[l]) for l in range(max_l + 1)}
    rep = {l: np.repeat(mixed_nl[l], n, axis=0) for l in range(max_l + 1)}
    cg_rel = _np_cgproduct(rep, sph, max_l)
    mixed_rel = {l: np.einsum('pmc,ct->pmt', cg_rel[l], w_rel[l]) for l in range(max_l + 1)}
    out = {}
    for l in range(max_l + 1):
        summed = mixed_rel[l].reshape(n, n, 2 * l + 1, -1).sum(axis=0)    # sum over a0
        out[l] = summed / summed.sum()                                    # NormalizeVecArr
    return out


# ----------------------------- setup & run ------------------------------------
def init_weights(key, tau_in_list, tau_out_list):
    ws = {}
    for l, (ti, to) in enumerate(zip(tau_in_list, tau_out_list)):
        key, kr, ki = jax.random.split(key, 3)
        ws[l] = (0.1 * jax.random.normal(kr, (ti, to), jnp.float32),
                 0.1 * jax.random.normal(ki, (ti, to), jnp.float32))
    return key, ws


if __name__ == "__main__":
    max_l = 1
    N = 8                      # number of vertices (atoms)
    tau_v = [4, 4]             # vertex channel multiplicities per l
    tau_mid = [4, 4]           # channels after weights_nl
    tau_sph = [1, 1]           # spherical-harmonic multiplicities

    key = jax.random.PRNGKey(0)

    vertex_parts = {}
    for l in range(max_l + 1):
        key, kr, ki = jax.random.split(key, 3)
        shape = (N, 2 * l + 1, tau_v[l])
        vertex_parts[l] = (jax.random.normal(kr, shape, jnp.float32),
                           jax.random.normal(ki, shape, jnp.float32))

    key, kc = jax.random.split(key)
    conn = (jax.random.uniform(kc, (N, N)) < 0.4).astype(jnp.float32)

    sph_parts = {}
    for l in range(max_l + 1):
        key, kr, ki = jax.random.split(key, 3)
        shape = (N * N, 2 * l + 1, tau_sph[l])
        sph_parts[l] = (jax.random.normal(kr, shape, jnp.float32),
                        jax.random.normal(ki, shape, jnp.float32))

    tau_cg_nl = cg_tau(tau_v, tau_v, max_l)
    key, weights_nl = init_weights(key, tau_cg_nl, tau_mid)
    tau_cg_rel = cg_tau(tau_mid, tau_sph, max_l)
    key, weights_rel = init_weights(key, tau_cg_rel, tau_v)

    out = cg_layer_forward(vertex_parts, conn, sph_parts, weights_nl, weights_rel, max_l)
    for l in range(max_l + 1):
        jax.block_until_ready(out[l][0])
        jax.block_until_ready(out[l][1])
        assert out[l][0].shape == (N, 2 * l + 1, tau_v[l])

    # correctness: compare against a float64 numpy reference of the same forward.
    ref = reference_forward(vertex_parts, conn, sph_parts, weights_nl, weights_rel, max_l)
    max_err, scale = 0.0, 0.0
    for l in range(max_l + 1):
        kr = np.asarray(out[l][0], np.float64)
        ki = np.asarray(out[l][1], np.float64)
        max_err = max(max_err,
                      float(np.max(np.abs(kr - ref[l].real))),
                      float(np.max(np.abs(ki - ref[l].imag))))
        scale = max(scale, float(np.max(np.abs(ref[l]))))
    assert max_err <= 2e-2 * (1.0 + scale), (max_err, scale)

    print("KERNEL_OK")
</pallas_src>

<mosaic_0001>
module attributes {stable_mosaic.version = 11 : i64} {
  func.func @_nl_kernel(%arg0: i32, %arg1: memref<8x8xf32, #tpu.memory_space<vmem>>, %arg2: memref<8x32xf32, #tpu.memory_space<vmem>>, %arg3: memref<512x128xf32, #tpu.memory_space<vmem>>, %arg4: memref<8x128xf32, #tpu.memory_space<vmem>>) attributes {dimension_semantics = [#tpu.dimension_semantics<parallel>], iteration_bounds = array<i64: 1>, scalar_prefetch = 0 : i64, scratch_operands = 0 : i64, tpu.core_type = #tpu.core_type<tc>, window_params = [{transform_indices = @transform_0, window_bounds = array<i64: 8, 8>}, {pipeline_mode = #tpu.pipeline_mode<synchronous>, transform_indices = @transform_1, window_bounds = array<i64: 8, 32>}, {pipeline_mode = #tpu.pipeline_mode<synchronous>, transform_indices = @transform_2, window_bounds = array<i64: 512, 128>}, {transform_indices = @transform_3, window_bounds = array<i64: 8, 128>}]} {
    %c0 = arith.constant 0 : index
    %c0_0 = arith.constant 0 : index
    %0 = vector.load %arg1[%c0, %c0_0] : memref<8x8xf32, #tpu.memory_space<vmem>>, vector<8x8xf32>
    %c0_1 = arith.constant 0 : index
    %c0_2 = arith.constant 0 : index
    %1 = vector.load %arg2[%c0_1, %c0_2] : memref<8x32xf32, #tpu.memory_space<vmem>>, vector<8x32xf32>
    %cst = arith.constant dense<0.000000e+00> : vector<8x32xf32>
    %2 = tpu.matmul %0, %1, %cst {dimension_numbers = #tpu.dot_dimension_numbers<[1], [0], [0], [1], [0, 0, 1, 1], [], []>} : vector<8x8xf32>, vector<8x32xf32>, vector<8x32xf32> -> vector<8x32xf32>
    %3 = vector.extract_strided_slice %2 {offsets = [0, 0], sizes = [8, 16], strides = [1, 1]} : vector<8x32xf32> to vector<8x16xf32>
    %4 = vector.extract_strided_slice %2 {offsets = [0, 16], sizes = [8, 16], strides = [1, 1]} : vector<8x32xf32> to vector<8x16xf32>
    %cst_3 = arith.constant 0.000000e+00 : f32
    %5 = vector.broadcast %cst_3 : f32 to vector<8x128xf32>
    %6 = vector.extract_strided_slice %3 {offsets = [0, 0], sizes = [8, 1], strides = [1, 1]} : vector<8x16xf32> to vector<8x1xf32>
    %7 = vector.extract_strided_slice %4 {offsets = [0, 0], sizes = [8, 1], strides = [1, 1]} : vector<8x16xf32> to vector<8x1xf32>
    %8 = vector.broadcast %6 : vector<8x1xf32> to vector<8x16xf32>
    %9 = arith.mulf %3, %8 : vector<8x16xf32>
    %10 = vector.broadcast %7 : vector<8x1xf32> to vector<8x16xf32>
    %11 = arith.mulf %4, %10 : vector<8x16xf32>
    %12 = arith.subf %9, %11 : vector<8x16xf32>
    %13 = vector.broadcast %7 : vector<8x1xf32> to vector<8x16xf32>
    %14 = arith.mulf %3, %13 : vector<8x16xf32>
    %15 = vector.broadcast %6 : vector<8x1xf32> to vector<8x16xf32>
    %16 = arith.mulf %4, %15 : vector<8x16xf32>
    %17 = arith.addf %14, %16 : vector<8x16xf32>
    %18 = vector.extract_strided_slice %3 {offsets = [0, 1], sizes = [8, 1], strides = [1, 1]} : vector<8x16xf32> to vector<8x1xf32>
    %19 = vector.extract_strided_slice %4 {offsets = [0, 1], sizes = [8, 1], strides = [1, 1]} : vector<8x16xf32> to vector<8x1xf32>
    %20 = vector.broadcast %18 : vector<8x1xf32> to vector<8x16xf32>
    %21 = arith.mulf %3, %20 : vector<8x16xf32>
    %22 = vector.broadcast %19 : vector<8x1xf32> to vector<8x16xf32>
    %23 = arith.mulf %4, %22 : vector<8x16xf32>
    %24 = arith.subf %21, %23 : vector<8x16xf32>
    %25 = vector.broadcast %19 : vector<8x1xf32> to vector<8x16xf32>
    %26 = arith.mulf %3, %25 : vector<8x16xf32>
    %27 = vector.broadcast %18 : vector<8x1xf32> to vector<8x16xf32>
    %28 = arith.mulf %4, %27 : vector<8x16xf32>
    %29 = arith.addf %26, %28 : vector<8x16xf32>
    %30 = vector.extract_strided_slice %3 {offsets = [0, 2], sizes = [8, 1], strides = [1, 1]} : vector<8x16xf32> to vector<8x1xf32>
    %31 = vector.extract_strided_slice %4 {offsets = [0, 2], sizes = [8, 1], strides = [1, 1]} : vector<8x16xf32> to vector<8x1xf32>
    %32 = vector.broadcast %30 : vector<8x1xf32> to vector<8x16xf32>
    %33 = arith.mulf %3, %32 : vector<8x16xf32>
    %34 = vector.broadcast %31 : vector<8x1xf32> to vector<8x16xf32>
    %35 = arith.mulf %4, %34 : vector<8x16xf32>
    %36 = arith.subf %33, %35 : vector<8x16xf32>
    %37 = vector.broadcast %31 : vector<8x1xf32> to vector<8x16xf32>
    %38 = arith.mulf %3, %37 : vector<8x16xf32>
    %39 = vector.broadcast %30 : vector<8x1xf32> to vector<8x16xf32>
    %40 = arith.mulf %4, %39 : vector<8x16xf32>
    %41 = arith.addf %38, %40 : vector<8x16xf32>
    %42 = vector.extract_strided_slice %3 {offsets = [0, 3], sizes = [8, 1], strides = [1, 1]} : vector<8x16xf32> to vector<8x1xf32>
    %43 = vector.extract_strided_slice %4 {offsets = [0, 3], sizes = [8, 1], strides = [1, 1]} : vector<8x16xf32> to vector<8x1xf32>
    %44 = vector.broadcast %42 : vector<8x1xf32> to vector<8x16xf32>
    %45 = arith.mulf %3, %44 : vector<8x16xf32>
    %46 = vector.broadcast %43 : vector<8x1xf32> to vector<8x16xf32>
    %47 = arith.mulf %4, %46 : vector<8x16xf32>
    %48 = arith.subf %45, %47 : vector<8x16xf32>
    %49 = vector.broadcast %43 : vector<8x1xf32> to vector<8x16xf32>
    %50 = arith.mulf %3, %49 : vector<8x16xf32>
    %51 = vector.broadcast %42 : vector<8x1xf32> to vector<8x16xf32>
    %52 = arith.mulf %4, %51 : vector<8x16xf32>
    %53 = arith.addf %50, %52 : vector<8x16xf32>
    %54 = tpu.concatenate %12, %17, %24, %29, %36, %41, %48, %53 in 1 : vector<8x16xf32>, vector<8x16xf32>, vector<8x16xf32>, vector<8x16xf32>, vector<8x16xf32>, vector<8x16xf32>, vector<8x16xf32>, vector<8x16xf32> -> vector<8x128xf32>
    %c0_4 = arith.constant 0 : index
    %c0_5 = arith.constant 0 : index
    %55 = vector.load %arg3[%c0_4, %c0_5] : memref<512x128xf32, #tpu.memory_space<vmem>>, vector<128x128xf32>
    %cst_6 = arith.constant dense<0.000000e+00> : vector<8x128xf32>
    %56 = tpu.matmul %54, %55, %cst_6 {dimension_numbers = #tpu.dot_dimension_numbers<[1], [0], [0], [1], [0, 0, 1, 1], [], []>} : vector<8x128xf32>, vector<128x128xf32>, vector<8x128xf32> -> vector<8x128xf32>
    %57 = arith.addf %5, %56 : vector<8x128xf32>
    %58 = vector.extract_strided_slice %3 {offsets = [0, 4], sizes = [8, 1], strides = [1, 1]} : vector<8x16xf32> to vector<8x1xf32>
    %59 = vector.extract_strided_slice %4 {offsets = [0, 4], sizes = [8, 1], strides = [1, 1]} : vector<8x16xf32> to vector<8x1xf32>
    %60 = vector.broadcast %58 : vector<8x1xf32> to vector<8x16xf32>
    %61 = arith.mulf %3, %60 : vector<8x16xf32>
    %62 = vector.broadcast %59 : vector<8x1xf32> to vector<8x16xf32>
    %63 = arith.mulf %4, %62 : vector<8x16xf32>
    %64 = arith.subf %61, %63 : vector<8x16xf32>
    %65 = vector.broadcast %59 : vector<8x1xf32> to vector<8x16xf32>
    %66 = arith.mulf %3, %65 : vector<8x16xf32>
    %67 = vector.broadcast %58 : vector<8x1xf32> to vector<8x16xf32>
    %68 = arith.mulf %4, %67 : vector<8x16xf32>
    %69 = arith.addf %66, %68 : vector<8x16xf32>
    %70 = vector.extract_strided_slice %3 {offsets = [0, 5], sizes = [8, 1], strides = [1, 1]} : vector<8x16xf32> to vector<8x1xf32>
    %71 = vector.extract_strided_slice %4 {offsets = [0, 5], sizes = [8, 1], strides = [1, 1]} : vector<8x16xf32> to vector<8x1xf32>
    %72 = vector.broadcast %70 : vector<8x1xf32> to vector<8x16xf32>
    %73 = arith.mulf %3, %72 : vector<8x16xf32>
    %74 = vector.broadcast %71 : vector<8x1xf32> to vector<8x16xf32>
    %75 = arith.mulf %4, %74 : vector<8x16xf32>
    %76 = arith.subf %73, %75 : vector<8x16xf32>
    %77 = vector.broadcast %71 : vector<8x1xf32> to vector<8x16xf32>
    %78 = arith.mulf %3, %77 : vector<8x16xf32>
    %79 = vector.broadcast %70 : vector<8x1xf32> to vector<8x16xf32>
    %80 = arith.mulf %4, %79 : vector<8x16xf32>
    %81 = arith.addf %78, %80 : vector<8x16xf32>
    %82 = vector.extract_strided_slice %3 {offsets = [0, 6], sizes = [8, 1], strides = [1, 1]} : vector<8x16xf32> to vector<8x1xf32>
    %83 = vector.extract_strided_slice %4 {offsets = [0, 6], sizes = [8, 1], strides = [1, 1]} : vector<8x16xf32> to vector<8x1xf32>
    %84 = vector.broadcast %82 : vector<8x1xf32> to vector<8x16xf32>
    %85 = arith.mulf %3, %84 : vector<8x16xf32>
    %86 = vector.broadcast %83 : vector<8x1xf32> to vector<8x16xf32>
    %87 = arith.mulf %4, %86 : vector<8x16xf32>
    %88 = arith.subf %85, %87 : vector<8x16xf32>
    %89 = vector.broadcast %83 : vector<8x1xf32> to vector<8x16xf32>
    %90 = arith.mulf %3, %89 : vector<8x16xf32>
    %91 = vector.broadcast %82 : vector<8x1xf32> to vector<8x16xf32>
    %92 = arith.mulf %4, %91 : vector<8x16xf32>
    %93 = arith.addf %90, %92 : vector<8x16xf32>
    %94 = vector.extract_strided_slice %3 {offsets = [0, 7], sizes = [8, 1], strides = [1, 1]} : vector<8x16xf32> to vector<8x1xf32>
    %95 = vector.extract_strided_slice %4 {offsets = [0, 7], sizes = [8, 1], strides = [1, 1]} : vector<8x16xf32> to vector<8x1xf32>
    %96 = vector.broadcast %94 : vector<8x1xf32> to vector<8x16xf32>
    %97 = arith.mulf %3, %96 : vector<8x16xf32>
    %98 = vector.broadcast %95 : vector<8x1xf32> to vector<8x16xf32>
    %99 = arith.mulf %4, %98 : vector<8x16xf32>
    %100 = arith.subf %97, %99 : vector<8x16xf32>
    %101 = vector.broadcast %95 : vector<8x1xf32> to vector<8x16xf32>
    %102 = arith.mulf %3, %101 : vector<8x16xf32>
    %103 = vector.broadcast %94 : vector<8x1xf32> to vector<8x16xf32>
    %104 = arith.mulf %4, %103 : vector<8x16xf32>
    %105 = arith.addf %102, %104 : vector<8x16xf32>
    %106 = tpu.concatenate %64, %69, %76, %81, %88, %93, %100, %105 in 1 : vector<8x16xf32>, vector<8x16xf32>, vector<8x16xf32>, vector<8x16xf32>, vector<8x16xf32>, vector<8x16xf32>, vector<8x16xf32>, vector<8x16xf32> -> vector<8x128xf32>
    %c128 = arith.constant 128 : index
    %c0_7 = arith.constant 0 : index
    %107 = vector.load %arg3[%c128, %c0_7] : memref<512x128xf32, #tpu.memory_space<vmem>>, vector<128x128xf32>
    %cst_8 = arith.constant dense<0.000000e+00> : vector<8x128xf32>
    %108 = tpu.matmul %106, %107, %cst_8 {dimension_numbers = #tpu.dot_dimension_numbers<[1], [0], [0], [1], [0, 0, 1, 1], [], []>} : vector<8x128xf32>, vector<128x128xf32>, vector<8x128xf32> -> vector<8x128xf32>
    %109 = arith.addf %57, %108 : vector<8x128xf32>
    %110 = vector.extract_strided_slice %3 {offsets = [0, 8], sizes = [8, 1], strides = [1, 1]} : vector<8x16xf32> to vector<8x1xf32>
    %111 = vector.extract_strided_slice %4 {offsets = [0, 8], sizes = [8, 1], strides = [1, 1]} : vector<8x16xf32> to vector<8x1xf32>
    %112 = vector.broadcast %110 : vector<8x1xf32> to vector<8x16xf32>
    %113 = arith.mulf %3, %112 : vector<8x16xf32>
    %114 = vector.broadcast %111 : vector<8x1xf32> to vector<8x16xf32>
    %115 = arith.mulf %4, %114 : vector<8x16xf32>
    %116 = arith.subf %113, %115 : vector<8x16xf32>
    %117 = vector.broadcast %111 : vector<8x1xf32> to vector<8x16xf32>
    %118 = arith.mulf %3, %117 : vector<8x16xf32>
    %119 = vector.broadcast %110 : vector<8x1xf32> to vector<8x16xf32>
    %120 = arith.mulf %4, %119 : vector<8x16xf32>
    %121 = arith.addf %118, %120 : vector<8x16xf32>
    %122 = vector.extract_strided_slice %3 {offsets = [0, 9], sizes = [8, 1], strides = [1, 1]} : vector<8x16xf32> to vector<8x1xf32>
    %123 = vector.extract_strided_slice %4 {offsets = [0, 9], sizes = [8, 1], strides = [1, 1]} : vector<8x16xf32> to vector<8x1xf32>
    %124 = vector.broadcast %122 : vector<8x1xf32> to vector<8x16xf32>
    %125 = arith.mulf %3, %124 : vector<8x16xf32>
    %126 = vector.broadcast %123 : vector<8x1xf32> to vector<8x16xf32>
    %127 = arith.mulf %4, %126 : vector<8x16xf32>
    %128 = arith.subf %125, %127 : vector<8x16xf32>
    %129 = vector.broadcast %123 : vector<8x1xf32> to vector<8x16xf32>
    %130 = arith.mulf %3, %129 : vector<8x16xf32>
    %131 = vector.broadcast %122 : vector<8x1xf32> to vector<8x16xf32>
    %132 = arith.mulf %4, %131 : vector<8x16xf32>
    %133 = arith.addf %130, %132 : vector<8x16xf32>
    %134 = vector.extract_strided_slice %3 {offsets = [0, 10], sizes = [8, 1], strides = [1, 1]} : vector<8x16xf32> to vector<8x1xf32>
    %135 = vector.extract_strided_slice %4 {offsets = [0, 10], sizes = [8, 1], strides = [1, 1]} : vector<8x16xf32> to vector<8x1xf32>
    %136 = vector.broadcast %134 : vector<8x1xf32> to vector<8x16xf32>
    %137 = arith.mulf %3, %136 : vector<8x16xf32>
    %138 = vector.broadcast %135 : vector<8x1xf32> to vector<8x16xf32>
    %139 = arith.mulf %4, %138 : vector<8x16xf32>
    %140 = arith.subf %137, %139 : vector<8x16xf32>
    %141 = vector.broadcast %135 : vector<8x1xf32> to vector<8x16xf32>
    %142 = arith.mulf %3, %141 : vector<8x16xf32>
    %143 = vector.broadcast %134 : vector<8x1xf32> to vector<8x16xf32>
    %144 = arith.mulf %4, %143 : vector<8x16xf32>
    %145 = arith.addf %142, %144 : vector<8x16xf32>
    %146 = vector.extract_strided_slice %3 {offsets = [0, 11], sizes = [8, 1], strides = [1, 1]} : vector<8x16xf32> to vector<8x1xf32>
    %147 = vector.extract_strided_slice %4 {offsets = [0, 11], sizes = [8, 1], strides = [1, 1]} : vector<8x16xf32> to vector<8x1xf32>
    %148 = vector.broadcast %146 : vector<8x1xf32> to vector<8x16xf32>
    %149 = arith.mulf %3, %148 : vector<8x16xf32>
    %150 = vector.broadcast %147 : vector<8x1xf32> to vector<8x16xf32>
    %151 = arith.mulf %4, %150 : vector<8x16xf32>
    %152 = arith.subf %149, %151 : vector<8x16xf32>
    %153 = vector.broadcast %147 : vector<8x1xf32> to vector<8x16xf32>
    %154 = arith.mulf %3, %153 : vector<8x16xf32>
    %155 = vector.broadcast %146 : vector<8x1xf32> to vector<8x16xf32>
    %156 = arith.mulf %4, %155 : vector<8x16xf32>
    %157 = arith.addf %154, %156 : vector<8x16xf32>
    %158 = tpu.concatenate %116, %121, %128, %133, %140, %145, %152, %157 in 1 : vector<8x16xf32>, vector<8x16xf32>, vector<8x16xf32>, vector<8x16xf32>, vector<8x16xf32>, vector<8x16xf32>, vector<8x16xf32>, vector<8x16xf32> -> vector<8x128xf32>
    %c256 = arith.constant 256 : index
    %c0_9 = arith.constant 0 : index
    %159 = vector.load %arg3[%c256, %c0_9] : memref<512x128xf32, #tpu.memory_space<vmem>>, vector<128x128xf32>
    %cst_10 = arith.constant dense<0.000000e+00> : vector<8x128xf32>
    %160 = tpu.matmul %158, %159, %cst_10 {dimension_numbers = #tpu.dot_dimension_numbers<[1], [0], [0], [1], [0, 0, 1, 1], [], []>} : vector<8x128xf32>, vector<128x128xf32>, vector<8x128xf32> -> vector<8x128xf32>
    %161 = arith.addf %109, %160 : vector<8x128xf32>
    %162 = vector.extract_strided_slice %3 {offsets = [0, 12], sizes = [8, 1], strides = [1, 1]} : vector<8x16xf32> to vector<8x1xf32>
    %163 = vector.extract_strided_slice %4 {offsets = [0, 12], sizes = [8, 1], strides = [1, 1]} : vector<8x16xf32> to vector<8x1xf32>
    %164 = vector.broadcast %162 : vector<8x1xf32> to vector<8x16xf32>
    %165 = arith.mulf %3, %164 : vector<8x16xf32>
    %166 = vector.broadcast %163 : vector<8x1xf32> to vector<8x16xf32>
    %167 = arith.mulf %4, %166 : vector<8x16xf32>
    %168 = arith.subf %165, %167 : vector<8x16xf32>
    %169 = vector.broadcast %163 : vector<8x1xf32> to vector<8x16xf32>
    %170 = arith.mulf %3, %169 : vector<8x16xf32>
    %171 = vector.broadcast %162 : vector<8x1xf32> to vector<8x16xf32>
    %172 = arith.mulf %4, %171 : vector<8x16xf32>
    %173 = arith.addf %170, %172 : vector<8x16xf32>
    %174 = vector.extract_strided_slice %3 {offsets = [0, 13], sizes = [8, 1], strides = [1, 1]} : vector<8x16xf32> to vector<8x1xf32>
    %175 = vector.extract_strided_slice %4 {offsets = [0, 13], sizes = [8, 1], strides = [1, 1]} : vector<8x16xf32> to vector<8x1xf32>
    %176 = vector.broadcast %174 : vector<8x1xf32> to vector<8x16xf32>
    %177 = arith.mulf %3, %176 : vector<8x16xf32>
    %178 = vector.broadcast %175 : vector<8x1xf32> to vector<8x16xf32>
    %179 = arith.mulf %4, %178 : vector<8x16xf32>
    %180 = arith.subf %177, %179 : vector<8x16xf32>
    %181 = vector.broadcast %175 : vector<8x1xf32> to vector<8x16xf32>
    %182 = arith.mulf %3, %181 : vector<8x16xf32>
    %183 = vector.broadcast %174 : vector<8x1xf32> to vector<8x16xf32>
    %184 = arith.mulf %4, %183 : vector<8x16xf32>
    %185 = arith.addf %182, %184 : vector<8x16xf32>
    %186 = vector.extract_strided_slice %3 {offsets = [0, 14], sizes = [8, 1], strides = [1, 1]} : vector<8x16xf32> to vector<8x1xf32>
    %187 = vector.extract_strided_slice %4 {offsets = [0, 14], sizes = [8, 1], strides = [1, 1]} : vector<8x16xf32> to vector<8x1xf32>
    %188 = vector.broadcast %186 : vector<8x1xf32> to vector<8x16xf32>
    %189 = arith.mulf %3, %188 : vector<8x16xf32>
    %190 = vector.broadcast %187 : vector<8x1xf32> to vector<8x16xf32>
    %191 = arith.mulf %4, %190 : vector<8x16xf32>
    %192 = arith.subf %189, %191 : vector<8x16xf32>
    %193 = vector.broadcast %187 : vector<8x1xf32> to vector<8x16xf32>
    %194 = arith.mulf %3, %193 : vector<8x16xf32>
    %195 = vector.broadcast %186 : vector<8x1xf32> to vector<8x16xf32>
    %196 = arith.mulf %4, %195 : vector<8x16xf32>
    %197 = arith.addf %194, %196 : vector<8x16xf32>
    %198 = vector.extract_strided_slice %3 {offsets = [0, 15], sizes = [8, 1], strides = [1, 1]} : vector<8x16xf32> to vector<8x1xf32>
    %199 = vector.extract_strided_slice %4 {offsets = [0, 15], sizes = [8, 1], strides = [1, 1]} : vector<8x16xf32> to vector<8x1xf32>
    %200 = vector.broadcast %198 : vector<8x1xf32> to vector<8x16xf32>
    %201 = arith.mulf %3, %200 : vector<8x16xf32>
    %202 = vector.broadcast %199 : vector<8x1xf32> to vector<8x16xf32>
    %203 = arith.mulf %4, %202 : vector<8x16xf32>
    %204 = arith.subf %201, %203 : vector<8x16xf32>
    %205 = vector.broadcast %199 : vector<8x1xf32> to vector<8x16xf32>
    %206 = arith.mulf %3, %205 : vector<8x16xf32>
    %207 = vector.broadcast %198 : vector<8x1xf32> to vector<8x16xf32>
    %208 = arith.mulf %4, %207 : vector<8x16xf32>
    %209 = arith.addf %206, %208 : vector<8x16xf32>
    %210 = tpu.concatenate %168, %173, %180, %185, %192, %197, %204, %209 in 1 : vector<8x16xf32>, vector<8x16xf32>, vector<8x16xf32>, vector<8x16xf32>, vector<8x16xf32>, vector<8x16xf32>, vector<8x16xf32>, vector<8x16xf32> -> vector<8x128xf32>
    %c384 = arith.constant 384 : index
    %c0_11 = arith.constant 0 : index
    %211 = vector.load %arg3[%c384, %c0_11] : memref<512x128xf32, #tpu.memory_space<vmem>>, vector<128x128xf32>
    %cst_12 = arith.constant dense<0.000000e+00> : vector<8x128xf32>
    %212 = tpu.matmul %210, %211, %cst_12 {dimension_numbers = #tpu.dot_dimension_numbers<[1], [0], [0], [1], [0, 0, 1, 1], [], []>} : vector<8x128xf32>, vector<128x128xf32>, vector<8x128xf32> -> vector<8x128xf32>
    %213 = arith.addf %161, %212 : vector<8x128xf32>
    %c0_13 = arith.constant 0 : index
    %c0_14 = arith.constant 0 : index
    %214 = vector.load %arg4[%c0_13, %c0_14] : memref<8x128xf32, #tpu.memory_space<vmem>>, vector<8x128xf32>
    tpu.vector_store %arg4[%c0_13, %c0_14], %213 {strides = array<i32>} : memref<8x128xf32, #tpu.memory_space<vmem>>, vector<8x128xf32>,
    return
  }
  func.func @transform_0(%arg0: i32) -> (i32, i32) {
    %c0_i32 = arith.constant 0 : i32
    %c0_i32_0 = arith.constant 0 : i32
    return %arg0, %c0_i32 : i32, i32
  }
  func.func @transform_1(%arg0: i32) -> (i32, i32) {
    %c0_i32 = arith.constant 0 : i32
    %c0_i32_0 = arith.constant 0 : i32
    %c0_i32_1 = arith.constant 0 : i32
    return %c0_i32, %c0_i32_0 : i32, i32
  }
  func.func @transform_2(%arg0: i32) -> (i32, i32) {
    %c0_i32 = arith.constant 0 : i32
    %c0_i32_0 = arith.constant 0 : i32
    %c0_i32_1 = arith.constant 0 : i32
    return %c0_i32, %c0_i32_0 : i32, i32
  }
  func.func @transform_3(%arg0: i32) -> (i32, i32) {
    %c0_i32 = arith.constant 0 : i32
    %c0_i32_0 = arith.constant 0 : i32
    return %arg0, %c0_i32 : i32, i32
  }
}

</mosaic_0001>

<bundles_post_ra>
// kernel: tpu_custom_call.1
= control target key start
LH: loop header
LB: loop body
LE: loop exit
PB: predicated region body
PF: predicated region fallthrough
CT: control target
= control target key end

     0   :  { %8 = vsyncpa [#allocation3], 0  ;;  %s1292_s0 = inlined_call_operand.hbm [shape: f32[8,8], index: 0, kind: input, shape index: {}]   ;;  %s1293_s1 = inlined_call_operand.hbm [shape: f32[8,32], index: 1, kind: input, shape index: {}]   ;;  %s1294_s2 = inlined_call_operand.hbm [shape: f32[512,128], index: 2, kind: input, shape index: {}]   ;;  %s1295_s3 = inlined_call_operand.hbm [shape: f32[8,128], index: 3, kind: output, shape index: {}]  }
   0x1   :  { %9 = vsyncpa [#allocation6], 0  ;;  %s27_s14 = sshll.u32 %s1293_s1, 4  ;;  %s28_s14 = int_to_ptr.hbm [resolvable:$true] %s27_s14 }
   0x2   :  { %10 = vsyncpa [#allocation4], 0  ;;  %s932_s15 = smov [#allocation5]   ;;  %s16_s19 = sshll.u32 %s1292_s0, 4  ;;  %s17_s19 = int_to_ptr.hbm [resolvable:$true] %s16_s19 }
   0x3   :  { %s29_s16 = sshll.u32 %s932_s15, 4  ;;  %s933_s20 = smov [#allocation2]   ;;  %s30_s16 = int_to_ptr.vmem [resolvable:$true] %s29_s16 }
   0x4   :  { %32 = dma.hbm_to_vmem [thread:$0]  %s28_s14, 128, %s30_s16, [#allocation6]  }
   0x5   :  { %s18_s21 = sshll.u32 %s933_s20, 4  ;;  %s37_s24 = sshll.u32 %s1294_s2, 4  ;;  %s19_s21 = int_to_ptr.vmem [resolvable:$true] %s18_s21  ;;  %s38_s24 = int_to_ptr.hbm [resolvable:$true] %s37_s24 }
   0x6   :  { %21 = dma.hbm_to_vmem [thread:$0]  %s17_s19, 128, %s19_s21, [#allocation3]  }
   0x7   :  { %s934_s1 = smov [#allocation7]   ;;  %s935_s26 = smov 128  }
   0x8   :  { %s39_s25 = sshll.u32 %s934_s1, 4  ;;  %s936_s27 = smov 8   ;;  %s40_s25 = int_to_ptr.vmem [resolvable:$true] %s39_s25 }
   0x9   :  { %45 = dma.hbm_to_vmem [thread:$0]  %s38_s24, 8192, %s40_s25, [#allocation6], %s935_s26, %s935_s26, %s936_s27  }
   0xa   :  { %926 = dma.done.wait [#allocation3], 128  }
   0xb   :  { %927 = vsyncadd [#allocation3], 4294967168 }
   0xc   :  { %928 = dma.done.wait [#allocation6], 8320  }
   0xd   :  { %929 = vsyncadd [#allocation6], 4294958976  ;;  %v937_v0 = vmov 18   ;;  %v938_v1 = vmov 1   ;;  %v939_v2 = vmov 0   ;;  %vm60_vm0 = vcmask 64512  }
   0xe   :  { %768 = vset.pattern.permute.xlu1 %v937_v0  ;;  %765 = vset.pattern.permute.xlu2 %v938_v1  ;;  %v59_v3 = vld [vmem:[#allocation5] sm:$0xff]  ;;  %v58_v4 = vld [vmem:[#allocation2] sm:$0xff]  ;;  %v940_v6 = vmov 25   ;;  %v941_v7 = vmov 17   ;;  %v942_v8 = vmov 16   ;;  %v943_v9 = vmov 10  }
   0xf   :  { %763 = vset.pattern.permute.xlu0 %v939_v2  ;;  %79 = vmatpush.msra.mxu0 %v59_v3  ;;  %v944_v10 = vmov 3   ;;  %v945_v11 = vmov 2   ;;  %v946_v12 = vmov 27   ;;  %v947_v13 = vmov 4   ;;  %s969_s0 = smov 112   ;;  %s970_s2 = smov 48  }
  0x10   :  { %717 = vmatmul.msk.f32.vlgmr.msra.gmra.mxu0 %vm60_vm0, %v58_v4  ;;  %v948_v14 = vmov 19   ;;  %v949_v15 = vmov 22   ;;  %v950_v16 = vmov 8   ;;  %v951_v17 = vmov 20   ;;  %s971_s28 = smov 16   ;;  %s972_s29 = smov 32  }
  0x11   :  { %v952_v18 = vmov 12   ;;  %v953_v19 = vmov 9   ;;  %v954_v20 = vmov 26   ;;  %v955_v21 = vmov 7   ;;  %s973_s30 = smov 64   ;;  %s974_s4 = smov 80  }
  0x12   :  { %v956_v22 = vmov 21   ;;  %v957_v23 = vmov 11   ;;  %v958_v24 = vmov 30   ;;  %v959_v25 = vmov 5   ;;  %s975_s5 = smov 96   ;;  %s976_s6 = smov [#allocation8]  }
  0x13   :  { %v960_v26 = vmov 29   ;;  %v961_v27 = vmov 15   ;;  %v962_v28 = vmov 6   ;;  %v963_v29 = vmov 31   ;;  %s704_s7 = sshll.u32 %s976_s6, 4  ;;  %s706_s10 = sshll.u32 %s1295_s3, 4  ;;  %s705_s7 = int_to_ptr.vmem [resolvable:$true] %s704_s7  ;;  %s707_s10 = int_to_ptr.hbm [resolvable:$true] %s706_s10 }
  0x14   :  { %v964_v30 = vmov 23   ;;  %v965_v32 = vmov 13   ;;  %v966_v34 = vmov 14   ;;  %v967_v36 = vmov 24  }
  0x15   :  { %v968_v40 = vmov 28   ;;  %vm193_vm1 = vcmask 130048   ;;  %vm195_vm2 = vcmask 261120   ;;  %vm197_vm3 = vcmask 392192  }
  0x16   :  { %vm199_vm4 = vcmask 523264   ;;  %vm201_vm5 = vcmask 654336   ;;  %vm203_vm6 = vcmask 785408   ;;  %vm205_vm7 = vcmask 916480  }
  0x8d   :  { %v1006_v5 = vpop.f32.mrf.mxu0 }
  0x8e   :  { %131 = vperm.xlu1 %768, %v1006_v5   ;;  %106 = vperm.xlu2 %765, %v1006_v5  }
  0x8f   :  { %86 = vperm.xlu0 %763, %v1006_v5  }
  0x96   :  { %774 = vset.pattern.permute.xlu1 %v940_v6  ;;  %766 = vset.pattern.permute.xlu2 %v941_v7 }
  0x97   :  { %764 = vset.pattern.permute.xlu0 %v942_v8  ;;  %420 = vperm.xlu1 %774, %v1006_v5  }
  0x98   :  { %111 = vperm.xlu2 %766, %v1006_v5   ;;  %91 = vperm.xlu0 %764, %v1006_v5  }
  0x9f   :  { %777 = vset.pattern.permute.xlu1 %v943_v9 }
  0xa0   :  { %769 = vset.pattern.permute.xlu2 %v944_v10  ;;  %767 = vset.pattern.permute.xlu0 %v945_v11 }
  0xa1   :  { %435 = vperm.xlu1 %777, %v1006_v5   ;;  %146 = vperm.xlu2 %769, %v1006_v5  }
  0xa2   :  { %126 = vperm.xlu0 %767, %v1006_v5  }
  0xa9   :  { %779 = vset.pattern.permute.xlu1 %v946_v12  ;;  %771 = vset.pattern.permute.xlu2 %v947_v13 }
  0xaa   :  { %770 = vset.pattern.permute.xlu0 %v948_v14  ;;  %460 = vperm.xlu1 %779, %v1006_v5  }
  0xab   :  { %224 = vperm.xlu2 %771, %v1006_v5   ;;  %151 = vperm.xlu0 %770, %v1006_v5  }
  0xb2   :  { %782 = vset.pattern.permute.xlu1 %v949_v15 }
  0xb3   :  { %773 = vset.pattern.permute.xlu2 %v950_v16  ;;  %772 = vset.pattern.permute.xlu0 %v951_v17 }
  0xb4   :  { %269 = vperm.xlu1 %782, %v1006_v5   ;;  %395 = vperm.xlu2 %773, %v1006_v5  }
  0xb5   :  { %229 = vperm.xlu0 %772, %v1006_v5  }
  0xbc   :  { %784 = vset.pattern.permute.xlu1 %v952_v18  ;;  %775 = vset.pattern.permute.xlu2 %v953_v19 }
  0xbd   :  { %776 = vset.pattern.permute.xlu0 %v954_v20  ;;  %547 = vperm.xlu1 %784, %v1006_v5  }
  0xbe   :  { %415 = vperm.xlu2 %775, %v1006_v5   ;;  %440 = vperm.xlu0 %776, %v1006_v5  }
  0xc5   :  { %787 = vset.pattern.permute.xlu1 %v955_v21 }
  0xc6   :  { %778 = vset.pattern.permute.xlu2 %v956_v22  ;;  %781 = vset.pattern.permute.xlu0 %v957_v23 }
  0xc7   :  { %284 = vperm.xlu1 %787, %v1006_v5   ;;  %249 = vperm.xlu2 %778, %v1006_v5  }
  0xc8   :  { %455 = vperm.xlu0 %781, %v1006_v5  }
  0xcf   :  { %789 = vset.pattern.permute.xlu1 %v958_v24  ;;  %780 = vset.pattern.permute.xlu2 %v959_v25 }
  0xd0   :  { %786 = vset.pattern.permute.xlu0 %v960_v26  ;;  %592 = vperm.xlu1 %789, %v1006_v5  }
  0xd1   :  { %244 = vperm.xlu2 %780, %v1006_v5   ;;  %572 = vperm.xlu0 %786, %v1006_v5  }
  0xd8   :  { %792 = vset.pattern.permute.xlu1 %v961_v27 }
  0xd9   :  { %783 = vset.pattern.permute.xlu2 %v962_v28  ;;  %791 = vset.pattern.permute.xlu0 %v963_v29 }
  0xda   :  { %607 = vperm.xlu1 %792, %v1006_v5   ;;  %264 = vperm.xlu2 %783, %v1006_v5  }
  0xdb   :  { %612 = vperm.xlu0 %791, %v1006_v5  }
  0xe2   :  { %785 = vset.pattern.permute.xlu2 %v964_v30 }
  0xe3   :  { %289 = vperm.xlu2 %785, %v1006_v5  }
  0xe8   :  { %v107_v31 = vpop.permute.xlu2 %106 }
  0xe9   :  { %v1044_v43 = vmul.f32 %v107_v31, %v1006_v5 }
  0xeb   :  { %788 = vset.pattern.permute.xlu2 %v965_v32 }
  0xec   :  { %567 = vperm.xlu2 %788, %v1006_v5  }
  0xf2   :  { %v112_v33 = vpop.permute.xlu2 %111 }
  0xf3   :  { %v1064_v52 = vmul.f32 %v112_v33, %v1006_v5 }
  0xf4   :  { %790 = vset.pattern.permute.xlu2 %v966_v34 }
  0xf5   :  { %587 = vperm.xlu2 %790, %v1006_v5  }
  0xfb   :  { %v147_v35 = vpop.permute.xlu2 %146 }
  0xfc   :  { %v1069_v53 = vmul.f32 %v147_v35, %v1006_v5 }
  0xfd   :  { %793 = vset.pattern.permute.xlu2 %v967_v36 }
  0xfe   :  { %400 = vperm.xlu2 %793, %v1006_v5  }
 0x100   :  { %v132_v39 = vpop.permute.xlu1 %131 }
 0x101   :  { %v87_v37 = vpop.permute.xlu0 %86  ;;  %v1054_v48 = vmul.f32 %v132_v39, %v1006_v5 }
 0x102   :  { %v1051_v46 = vmul.f32 %v87_v37, %v1006_v5 }
 0x105   :  { %v225_v38 = vpop.permute.xlu2 %224 }
 0x106   :  { %794 = vset.pattern.permute.xlu2 %v968_v40  ;;  %v1097_v0 = vmul.f32 %v225_v38, %v1006_v5 }
 0x107   :  { %552 = vperm.xlu2 %794, %v1006_v5  }
 0x109   :  { %v421_v45 = vpop.permute.xlu1 %420 }
 0x10a   :  { %v92_v41 = vpop.permute.xlu0 %91  ;;  %v1084_v59 = vmul.f32 %v421_v45, %v1006_v5 }
 0x10b   :  { %v1041_v42 = vmul.f32 %v92_v41, %v1006_v5 }
 0x10d   :  { %96 = vrot.lane.b32.xlu1 %v1041_v42, %s969_s0 }
 0x10e   :  { %v396_v44 = vpop.permute.xlu2 %395 }
 0x10f   :  { %121 = vrot.lane.b32.xlu2 %v1044_v43, %s969_s0  ;;  %v1121_v10 = vmul.f32 %v396_v44, %v1006_v5 }
 0x113   :  { %v436_v51 = vpop.permute.xlu1 %435 }
 0x114   :  { %v127_v47 = vpop.permute.xlu0 %126  ;;  %v1076_v55 = vmul.f32 %v436_v51, %v1006_v5 }
 0x115   :  { %101 = vrot.lane.b32.xlu1 %v1051_v46, %s969_s0  ;;  %v1079_v57 = vmul.f32 %v127_v47, %v1006_v5 }
 0x117   :  { %136 = vrot.lane.b32.xlu2 %v1054_v48, %s969_s0 }
 0x118   :  { %v416_v49 = vpop.permute.xlu2 %415 }
 0x119   :  { %v1061_v50 = vmul.f32 %v416_v49, %v1006_v5 }
 0x11b   :  { %430 = vrot.lane.b32.xlu0 %v1061_v50, %s969_s0 }
 0x11c   :  { %v461_v58 = vpop.permute.xlu1 %460 }
 0x11d   :  { %v152_v54 = vpop.permute.xlu0 %151  ;;  %116 = vrot.lane.b32.xlu1 %v1064_v52, %s969_s0  ;;  %v1112_v7 = vmul.f32 %v461_v58, %v1006_v5 }
 0x11e   :  { %v1091_v61 = vmul.f32 %v152_v54, %v1006_v5 }
 0x11f   :  { %161 = vrot.lane.b32.xlu2 %v1069_v53, %s969_s0 }
 0x121   :  { %v250_v56 = vpop.permute.xlu2 %249 }
 0x122   :  { %v252_v20 = vmul.f32 %v250_v56, %v1006_v5 }
 0x123   :  { %450 = vrot.lane.b32.xlu0 %v1076_v55, %s969_s0 }
 0x125   :  { %141 = vrot.lane.b32.xlu1 %v1079_v57, %s969_s0 }
 0x126   :  { %v270_v1 = vpop.permute.xlu1 %269 }
 0x127   :  { %425 = vrot.lane.b32.xlu2 %v1084_v59, %s969_s0  ;;  %v230_v60 = vpop.permute.xlu0 %229  ;;  %v1109_v4 = vmul.f32 %v270_v1, %v1006_v5 }
 0x128   :  { %v1106_v3 = vmul.f32 %v230_v60, %v1006_v5 }
 0x12b   :  { %v245_v62 = vpop.permute.xlu2 %244 }
 0x12c   :  { %v1094_v63 = vmul.f32 %v245_v62, %v1006_v5 }
 0x12d   :  { %156 = vrot.lane.b32.xlu1 %v1091_v61, %s969_s0 }
 0x12e   :  { %259 = vrot.lane.b32.xlu0 %v1094_v63, %s969_s0 }
 0x12f   :  { %239 = vrot.lane.b32.xlu2 %v1097_v0, %s969_s0  ;;  %v548_v8 = vpop.permute.xlu1 %547 }
 0x130   :  { %v441_v2 = vpop.permute.xlu0 %440  ;;  %v1124_v11 = vmul.f32 %v548_v8, %v1006_v5 }
 0x131   :  { %v1136_v15 = vmul.f32 %v441_v2, %v1006_v5 }
 0x134   :  { %v265_v6 = vpop.permute.xlu2 %264 }
 0x135   :  { %234 = vrot.lane.b32.xlu1 %v1106_v3, %s969_s0  ;;  %v1169_v28 = vmul.f32 %v265_v6, %v1006_v5 }
 0x136   :  { %274 = vrot.lane.b32.xlu0 %v1109_v4, %s969_s0 }
 0x137   :  { %465 = vrot.lane.b32.xlu2 %v1112_v7, %s969_s0 }
 0x139   :  { %v285_v14 = vpop.permute.xlu1 %284 }
 0x13a   :  { %v456_v9 = vpop.permute.xlu0 %455  ;;  %v1139_v17 = vmul.f32 %v285_v14, %v1006_v5 }
 0x13b   :  { %v1163_v25 = vmul.f32 %v456_v9, %v1006_v5 }
 0x13d   :  { %v290_v12 = vpop.permute.xlu2 %289  ;;  %410 = vrot.lane.b32.xlu1 %v1121_v10, %s969_s0 }
 0x13e   :  { %v1129_v13 = vmul.f32 %v290_v12, %v1006_v5 }
 0x13f   :  { %562 = vrot.lane.b32.xlu2 %v1124_v11, %s969_s0 }
 0x140   :  { %294 = vrot.lane.b32.xlu0 %v1129_v13, %s969_s0 }
 0x142   :  { %v593_v31 = vpop.permute.xlu1 %592 }
 0x143   :  { %v573_v16 = vpop.permute.xlu0 %572  ;;  %v1181_v34 = vmul.f32 %v593_v31, %v1006_v5 }
 0x144   :  { %v1175_v30 = vmul.f32 %v573_v16, %v1006_v5 }
 0x145   :  { %445 = vrot.lane.b32.xlu1 %v1136_v15, %s969_s0 }
 0x146   :  { %v568_v18 = vpop.permute.xlu2 %567 }
 0x147   :  { %v1144_v19 = vmul.f32 %v568_v18, %v1006_v5  ;;  %299 = vrot.lane.b32.xlu2 %v1139_v17, %s969_s0 }
 0x149   :  { %582 = vrot.lane.b32.xlu0 %v1144_v19, %s969_s0 }
 0x14c   :  { %v608_v35 = vpop.permute.xlu1 %607 }
 0x14d   :  { %v613_v21 = vpop.permute.xlu0 %612  ;;  %254 = vrot.lane.b32.xlu1 %v252_v20, %s969_s0  ;;  %v1187_v36 = vmul.f32 %v608_v35, %v1006_v5 }
 0x14e   :  { %v1153_v22 = vmul.f32 %v613_v21, %v1006_v5 }
 0x14f   :  { %v588_v23 = vpop.permute.xlu2 %587 }
 0x150   :  { %v1156_v24 = vmul.f32 %v588_v23, %v1006_v5 }
 0x151   :  { %617 = vrot.lane.b32.xlu0 %v1153_v22, %s969_s0 }
 0x152   :  { %602 = vrot.lane.b32.xlu2 %v1156_v24, %s969_s0 }
 0x155   :  { %470 = vrot.lane.b32.xlu1 %v1163_v25, %s969_s0 }
 0x158   :  { %v401_v26 = vpop.permute.xlu2 %400 }
 0x159   :  { %v403_v27 = vmul.f32 %v401_v26, %v1006_v5 }
 0x15b   :  { %405 = vrot.lane.b32.xlu2 %v403_v27, %s969_s0 }
 0x15d   :  { %279 = vrot.lane.b32.xlu1 %v1169_v28, %s969_s0 }
 0x161   :  { %v553_v29 = vpop.permute.xlu2 %552 }
 0x162   :  { %v555_v37 = vmul.f32 %v553_v29, %v1006_v5 }
 0x165   :  { %577 = vrot.lane.b32.xlu1 %v1175_v30, %s969_s0 }
 0x169   :  { %v122_v32 = vpop.permute.xlu2 %121 }
 0x16a   :  { %v124_v33 = vadd.f32 %v122_v32, %v1064_v52 }
 0x16c   :  { %174 = vrot.lane.b32.xlu0 %v124_v33, %s970_s2 }
 0x16d   :  { %597 = vrot.lane.b32.xlu1 %v1181_v34, %s969_s0 }
 0x171   :  { %v137_v40 = vpop.permute.xlu2 %136 }
 0x172   :  { %v139_v47 = vsub.f32 %v1079_v57, %v137_v40 }
 0x175   :  { %622 = vrot.lane.b32.xlu1 %v1187_v36, %s969_s0 }
 0x179   :  { %v162_v51 = vpop.permute.xlu2 %161 }
 0x17a   :  { %v164_v52 = vadd.f32 %v162_v51, %v1091_v61 }
 0x17d   :  { %557 = vrot.lane.b32.xlu1 %v555_v37, %s969_s0 }
 0x17f   :  { %v1193_v38 = vpop.permute.xlu1 %96 }
 0x181   :  { %v426_v56 = vpop.permute.xlu2 %425 }
 0x187   :  { %v102_v39 = vpop.permute.xlu1 %101 }
 0x188   :  { %v104_v41 = vadd.f32 %v102_v39, %v1041_v42 }
 0x18a   :  { %166 = vrot.lane.b32.xlu1 %v104_v41, %s971_s28  ;;  %v221_v41 = vld [vmem:[#allocation7 + $0x70] sm:$0xff] }
 0x18d   :  { %v431_v44 = vpop.permute.xlu0 %430 }
 0x18e   :  { %v433_v60 = vadd.f32 %v431_v44, %v1084_v59 }
 0x18f   :  { %v117_v45 = vpop.permute.xlu1 %116 }
 0x190   :  { %v119_v49 = vsub.f32 %v1044_v43, %v117_v45  ;;  %v220_v45 = vld [vmem:[#allocation7 + $0x68] sm:$0xff] }
 0x192   :  { %170 = vrot.lane.b32.xlu2 %v119_v49, %s972_s29  ;;  %178 = vrot.lane.b32.xlu1 %v139_v47, %s973_s30 }
 0x195   :  { %v451_v42 = vpop.permute.xlu0 %450 }
 0x196   :  { %v453_v39 = vadd.f32 %v451_v42, %v1136_v15  ;;  %v218_v42 = vld [vmem:[#allocation7 + $0x58] sm:$0xff] }
 0x197   :  { %v142_v5 = vpop.permute.xlu1 %141 }
 0x198   :  { %v144_v54 = vadd.f32 %v142_v5, %v1054_v48  ;;  %v240_v48 = vpop.permute.xlu2 %239 }
 0x199   :  { %v242_v8 = vadd.f32 %v240_v48, %v1106_v3  ;;  %v208_v48 = vld [vmem:[#allocation7 + $0x8] sm:$0xff] }
 0x19a   :  { %182 = vrot.lane.b32.xlu2 %v144_v54, %s974_s4  ;;  %190 = vrot.lane.b32.xlu1 %v164_v52, %s969_s0  ;;  %v219_v52 = vld [vmem:[#allocation7 + $0x60] sm:$0xff] }
 0x19f   :  { %v157_v43 = vpop.permute.xlu1 %156 }
 0x1a0   :  { %v260_v57 = vpop.permute.xlu0 %259  ;;  %v159_v58 = vsub.f32 %v1069_v53, %v157_v43  ;;  %v466_v9 = vpop.permute.xlu2 %465 }
 0x1a1   :  { %v262_v62 = vadd.f32 %v260_v57, %v252_v20  ;;  %v468_v59 = vsub.f32 %v1163_v25, %v466_v9  ;;  %v212_v57 = vld [vmem:[#allocation7 + $0x28] sm:$0xff] }
 0x1a2   :  { %186 = vrot.lane.b32.xlu0 %v159_v58, %s975_s5 }
 0x1a3   :  { %v805_v61 = vpack.i.bf16 %v262_v62, %v433_v60  ;;  %v211_v60 = vld [vmem:[#allocation7 + $0x20] sm:$0xff]  ;;  %v210_v62 = vld [vmem:[#allocation7 + $0x18] sm:$0xff] }
 0x1a5   :  { %806 = vrot.lane.b32.xlu2 %v805_v61, %s970_s2  ;;  %v209_v61 = vld [vmem:[#allocation7 + $0x10] sm:$0xff] }
 0x1a7   :  { %v1209_v1 = vpop.permute.xlu1 %234 }
 0x1a8   :  { %v275_v2 = vpop.permute.xlu0 %274  ;;  %v563_v26 = vpop.permute.xlu2 %562 }
 0x1a9   :  { %v277_v21 = vsub.f32 %v1169_v28, %v275_v2 }
 0x1af   :  { %v411_v6 = vpop.permute.xlu1 %410 }
 0x1b0   :  { %v413_v12 = vadd.f32 %v411_v6, %v403_v27  ;;  %v565_v27 = vadd.f32 %v563_v26, %v555_v37  ;;  %v300_v32 = vpop.permute.xlu2 %299  ;;  %v523_v26 = vld [vmem:[#allocation7 + $0x170] sm:$0xff] }
 0x1b1   :  { %v302_v28 = vadd.f32 %v300_v32, %v1129_v13  ;;  %v520_v32 = vld [vmem:[#allocation7 + $0x158] sm:$0xff] }
 0x1b2   :  { %v795_v14 = vpack.i.bf16 %v242_v8, %v413_v12  ;;  %v295_v53 = vpop.permute.xlu0 %294  ;;  %v99_v12 = vsub.f32 %v1051_v46, %v1193_v38  ;;  %v522_v38 = vld [vmem:[#allocation7 + $0x168] sm:$0xff] }
 0x1b3   :  { %v297_v16 = vsub.f32 %v1139_v17, %v295_v53  ;;  %v428_v17 = vsub.f32 %v1061_v50, %v426_v56  ;;  %v215_v56 = vld [vmem:[#allocation7 + $0x40] sm:$0xff]  ;;  %v353_v53 = vld [vmem:[#allocation7 + $0xf8] sm:$0xff] }
 0x1b4   :  { %796 = vrot.lane.b32.xlu0 %v795_v14, %s971_s28  ;;  %354 = vmatpush.msra.mxu1 %v353_v53  ;;  %v664_v53 = vld [vmem:[#allocation7 + $0x198] sm:$0xff] }
 0x1b5   :  { %v820_v18 = vpack.i.bf16 %v297_v16, %v468_v59  ;;  %v524_v59 = vld [vmem:[#allocation7 + $0x178] sm:$0xff] }
 0x1b6   :  { %525 = vmatpush.msra.mxu3 %v524_v59 }
 0x1b7   :  { %821 = vrot.lane.b32.xlu2 %v820_v18, %s975_s5  ;;  %v446_v20 = vpop.permute.xlu1 %445 }
 0x1b8   :  { %v448_v23 = vsub.f32 %v1076_v55, %v446_v20  ;;  %526 = vmatpush.msra.mxu3 %v523_v26 }
 0x1ba   :  { %v810_v3 = vpack.i.bf16 %v277_v21, %v448_v23  ;;  %v352_v23 = vld [vmem:[#allocation7 + $0xf0] sm:$0xff]  ;;  %527 = vmatpush.msra.mxu3 %v522_v38 }
 0x1bb   :  { %v583_v44 = vpop.permute.xlu0 %582  ;;  %355 = vmatpush.msra.mxu1 %v352_v23 }
 0x1bc   :  { %811 = vrot.lane.b32.xlu0 %v810_v3, %s973_s30  ;;  %v585_v13 = vadd.f32 %v583_v44, %v1175_v30  ;;  %v216_v30 = vld [vmem:[#allocation7 + $0x48] sm:$0xff] }
 0x1bd   :  { %v351_v3 = vld [vmem:[#allocation7 + $0xe8] sm:$0xff] }
 0x1be   :  { %356 = vmatpush.msra.mxu1 %v351_v3  ;;  %v347_v44 = vld [vmem:[#allocation7 + $0xc8] sm:$0xff] }
 0x1bf   :  { %627 = vrot.lane.b32.xlu2 %v565_v27, %s971_s28  ;;  %v255_v25 = vpop.permute.xlu1 %254 }
 0x1c0   :  { %v257_v29 = vsub.f32 %v1094_v63, %v255_v25  ;;  %v222_v63 = vld [vmem:[#allocation7 + $0x78] sm:$0xff] }
 0x1c1   :  { %374 = vmatpush.msra.mxu2 %v222_v63  ;;  %v348_v63 = vld [vmem:[#allocation7 + $0xd0] sm:$0xff] }
 0x1c2   :  { %v800_v31 = vpack.i.bf16 %v257_v29, %v428_v17  ;;  %v350_v17 = vld [vmem:[#allocation7 + $0xe0] sm:$0xff] }
 0x1c3   :  { %375 = vmatpush.msra.mxu2 %v221_v41  ;;  %v618_v15 = vpop.permute.xlu0 %617  ;;  %v521_v29 = vld [vmem:[#allocation7 + $0x160] sm:$0xff]  ;;  %357 = vmatpush.msra.mxu1 %v350_v17  ;;  %v519_v41 = vld [vmem:[#allocation7 + $0x150] sm:$0xff] }
 0x1c4   :  { %801 = vrot.lane.b32.xlu1 %v800_v31, %s972_s29  ;;  %v620_v54 = vsub.f32 %v1187_v36, %v618_v15  ;;  %v213_v36 = vld [vmem:[#allocation7 + $0x30] sm:$0xff]  ;;  %v349_v31 = vld [vmem:[#allocation7 + $0xd8] sm:$0xff]  ;;  %528 = vmatpush.msra.mxu3 %v521_v29  ;;  %v674_v15 = vld [vmem:[#allocation7 + $0x1e8] sm:$0xff] }
 0x1c5   :  { %376 = vmatpush.msra.mxu2 %v220_v45  ;;  %358 = vmatpush.msra.mxu1 %v349_v31  ;;  %v518_v45 = vld [vmem:[#allocation7 + $0x148] sm:$0xff] }
 0x1c6   :  { %529 = vmatpush.msra.mxu3 %v520_v32 }
 0x1c7   :  { %v471_v33 = vpop.permute.xlu1 %470  ;;  %377 = vmatpush.msra.mxu2 %v219_v52  ;;  %359 = vmatpush.msra.mxu1 %v348_v63  ;;  %v515_v52 = vld [vmem:[#allocation7 + $0x130] sm:$0xff] }
 0x1c8   :  { %v473_v55 = vadd.f32 %v471_v33, %v1112_v7  ;;  %530 = vmatpush.msra.mxu3 %v519_v41 }
 0x1c9   :  { %378 = vmatpush.msra.mxu2 %v218_v42  ;;  %360 = vmatpush.msra.mxu1 %v347_v44  ;;  %v672_v42 = vld [vmem:[#allocation7 + $0x1d8] sm:$0xff] }
 0x1ca   :  { %v825_v35 = vpack.i.bf16 %v302_v28, %v473_v55  ;;  %531 = vmatpush.msra.mxu3 %v518_v45 }
 0x1cc   :  { %826 = vrot.lane.b32.xlu0 %v825_v35, %s969_s0 }
 0x1cf   :  { %v280_v37 = vpop.permute.xlu1 %279 }
 0x1d0   :  { %v282_v40 = vadd.f32 %v280_v37, %v1109_v4  ;;  %v603_v4 = vpop.permute.xlu2 %602 }
 0x1d1   :  { %v605_v51 = vadd.f32 %v603_v4, %v1181_v34  ;;  %v214_v34 = vld [vmem:[#allocation7 + $0x38] sm:$0xff]  ;;  %v675_v4 = vld [vmem:[#allocation7 + $0x1f0] sm:$0xff] }
 0x1d2   :  { %v815_v50 = vpack.i.bf16 %v282_v40, %v453_v39 }
 0x1d4   :  { %816 = vrot.lane.b32.xlu1 %v815_v50, %s974_s4 }
 0x1d7   :  { %v578_v47 = vpop.permute.xlu1 %577 }
 0x1d8   :  { %v580_v7 = vsub.f32 %v1144_v19, %v578_v47  ;;  %v217_v19 = vld [vmem:[#allocation7 + $0x50] sm:$0xff]  ;;  %v1241_v58 = vpop.permute.xlu2 %405  ;;  %v676_v47 = vld [vmem:[#allocation7 + $0x1f8] sm:$0xff] }
 0x1d9   :  { %379 = vmatpush.msra.mxu2 %v217_v19  ;;  %677 = vmatpush.msrb.mxu0 %v676_v47  ;;  %v514_v19 = vld [vmem:[#allocation7 + $0x128] sm:$0xff]  ;;  %v408_v17 = vsub.f32 %v1121_v10, %v1241_v58 }
 0x1da   :  { %631 = vrot.lane.b32.xlu0 %v580_v7, %s972_s29  ;;  %v346_v7 = vld [vmem:[#allocation7 + $0xc0] sm:$0xff] }
 0x1db   :  { %380 = vmatpush.msra.mxu2 %v216_v30  ;;  %678 = vmatpush.msrb.mxu0 %v675_v4  ;;  %v671_v30 = vld [vmem:[#allocation7 + $0x1d0] sm:$0xff] }
 0x1dc   :  { %635 = vrot.lane.b32.xlu1 %v585_v13, %s970_s2  ;;  %v517_v13 = vld [vmem:[#allocation7 + $0x140] sm:$0xff]  ;;  %361 = vmatpush.msra.mxu1 %v346_v7 }
 0x1dd   :  { %381 = vmatpush.msra.mxu2 %v215_v56  ;;  %532 = vmatpush.msra.mxu3 %v517_v13  ;;  %v342_v56 = vld [vmem:[#allocation7 + $0xa0] sm:$0xff] }
 0x1de   :  { %v175_v20 = vpop.permute.xlu0 %174  ;;  %679 = vmatpush.msrb.mxu0 %v674_v15 }
 0x1df   :  { %v598_v49 = vpop.permute.xlu1 %597  ;;  %382 = vmatpush.msra.mxu2 %v214_v34  ;;  %v341_v34 = vld [vmem:[#allocation7 + $0x98] sm:$0xff] }
 0x1e0   :  { %v600_v5 = vsub.f32 %v1156_v24, %v598_v49  ;;  %v516_v49 = vld [vmem:[#allocation7 + $0x138] sm:$0xff] }
 0x1e1   :  { %383 = vmatpush.msra.mxu2 %v213_v36  ;;  %533 = vmatpush.msra.mxu3 %v516_v49  ;;  %v512_v36 = vld [vmem:[#allocation7 + $0x118] sm:$0xff] }
 0x1e2   :  { %643 = vrot.lane.b32.xlu0 %v605_v51, %s974_s4  ;;  %639 = vrot.lane.b32.xlu2 %v600_v5, %s973_s30  ;;  %v673_v51 = vld [vmem:[#allocation7 + $0x1e0] sm:$0xff]  ;;  %v344_v5 = vld [vmem:[#allocation7 + $0xb0] sm:$0xff] }
 0x1e3   :  { %384 = vmatpush.msra.mxu2 %v212_v57  ;;  %680 = vmatpush.msrb.mxu0 %v673_v51  ;;  %v669_v57 = vld [vmem:[#allocation7 + $0x1c0] sm:$0xff] }
 0x1e4   :  { %647 = vrot.lane.b32.xlu1 %v620_v54, %s975_s5  ;;  %v343_v54 = vld [vmem:[#allocation7 + $0xa8] sm:$0xff]  ;;  %534 = vmatpush.msra.mxu3 %v515_v52 }
 0x1e5   :  { %385 = vmatpush.msra.mxu2 %v211_v60  ;;  %681 = vmatpush.msrb.mxu0 %v672_v42  ;;  %v340_v60 = vld [vmem:[#allocation7 + $0x90] sm:$0xff] }
 0x1e6   :  { %535 = vmatpush.msra.mxu3 %v514_v19 }
 0x1e7   :  { %v623_v43 = vpop.permute.xlu1 %622  ;;  %386 = vmatpush.msra.mxu2 %v210_v62  ;;  %682 = vmatpush.msrb.mxu0 %v671_v30  ;;  %v511_v62 = vld [vmem:[#allocation7 + $0x110] sm:$0xff] }
 0x1e8   :  { %v625_v24 = vadd.f32 %v623_v43, %v1153_v22  ;;  %v207_v22 = vld [vmem:[#allocation7] sm:$0xff] }
 0x1e9   :  { %387 = vmatpush.msra.mxu2 %v209_v61  ;;  %v513_v43 = vld [vmem:[#allocation7 + $0x120] sm:$0xff]  ;;  %v668_v61 = vld [vmem:[#allocation7 + $0x1b8] sm:$0xff] }
 0x1ea   :  { %651 = vrot.lane.b32.xlu2 %v625_v24, %s969_s0  ;;  %v670_v24 = vld [vmem:[#allocation7 + $0x1c8] sm:$0xff]  ;;  %536 = vmatpush.msra.mxu3 %v513_v43 }
 0x1eb   :  { %388 = vmatpush.msra.mxu2 %v208_v48  ;;  %683 = vmatpush.msrb.mxu0 %v670_v24  ;;  %v339_v48 = vld [vmem:[#allocation7 + $0x88] sm:$0xff] }
 0x1ec   :  { %v171_v2 = vpop.permute.xlu2 %170  ;;  %537 = vmatpush.msra.mxu3 %v512_v36 }
 0x1ed   :  { %389 = vmatpush.msra.mxu2 %v207_v22  ;;  %684 = vmatpush.msrb.mxu0 %v669_v57  ;;  %v667_v22 = vld [vmem:[#allocation7 + $0x1b0] sm:$0xff] }
 0x1ee   :  { %538 = vmatpush.msra.mxu3 %v511_v62 }
 0x1ef   :  { %v558_v6 = vpop.permute.xlu1 %557  ;;  %685 = vmatpush.msrb.mxu0 %v668_v61 }
 0x1f0   :  { %v560_v39 = vsub.f32 %v1124_v11, %v558_v6  ;;  %v345_v11 = vld [vmem:[#allocation7 + $0xb8] sm:$0xff]  ;;  %v338_v6 = vld [vmem:[#allocation7 + $0x80] sm:$0xff] }
 0x1f1   :  { %362 = vmatpush.msra.mxu1 %v345_v11  ;;  %686 = vmatpush.msrb.mxu0 %v667_v22 }
 0x1f3   :  { %363 = vmatpush.msra.mxu1 %v344_v5 }
 0x1f4   :  { %v183_v8 = vpop.permute.xlu2 %182 }
 0x1f5   :  { %364 = vmatpush.msra.mxu1 %v343_v54 }
 0x1f7   :  { %365 = vmatpush.msra.mxu1 %v342_v56 }
 0x1f9   :  { %366 = vmatpush.msra.mxu1 %v341_v34 }
 0x1fb   :  { %367 = vmatpush.msra.mxu1 %v340_v60 }
 0x1fc   :  { %v167_v9 = vpop.permute.xlu1 %166 }
 0x1fd   :  { %v194_v16 = vsel %vm193_vm1, %v99_v12, %v167_v9  ;;  %368 = vmatpush.msra.mxu1 %v339_v48  ;;  %v666_v9 = vld [vmem:[#allocation7 + $0x1a8] sm:$0xff]  ;;  %v665_v12 = vld [vmem:[#allocation7 + $0x1a0] sm:$0xff] }
 0x1fe   :  { %v196_v21 = vsel %vm195_vm2, %v194_v16, %v171_v2  ;;  %v510_v2 = vld [vmem:[#allocation7 + $0x108] sm:$0xff]  ;;  %687 = vmatpush.msrb.mxu0 %v666_v9  ;;  %v663_v16 = vld [vmem:[#allocation7 + $0x190] sm:$0xff] }
 0x1ff   :  { %v1245_v14 = vpop.permute.xlu2 %806  ;;  %v198_v46 = vsel %vm197_vm3, %v196_v21, %v175_v20  ;;  %539 = vmatpush.msra.mxu3 %v510_v2  ;;  %369 = vmatpush.msra.mxu1 %v338_v6  ;;  %v661_v20 = vld [vmem:[#allocation7 + $0x180] sm:$0xff] }
 0x200   :  { %688 = vmatpush.msrb.mxu0 %v665_v12 }
 0x202   :  { %689 = vmatpush.msrb.mxu0 %v664_v53 }
 0x204   :  { %v179_v18 = vpop.permute.xlu1 %178  ;;  %690 = vmatpush.msrb.mxu0 %v663_v16 }
 0x205   :  { %v200_v27 = vsel %vm199_vm4, %v198_v46, %v179_v18  ;;  %v662_v18 = vld [vmem:[#allocation7 + $0x188] sm:$0xff] }
 0x206   :  { %v202_v33 = vsel %vm201_vm5, %v200_v27, %v183_v8  ;;  %v509_v8 = vld [vmem:[#allocation7 + $0x100] sm:$0xff]  ;;  %691 = vmatpush.msrb.mxu0 %v662_v18  ;;  %v237_v27 = vsub.f32 %v1097_v0, %v1209_v1 }
 0x207   :  { %540 = vmatpush.msra.mxu3 %v509_v8 }
 0x208   :  { %692 = vmatpush.msrb.mxu0 %v661_v20 }
 0x20c   :  { %v191_v55 = vpop.permute.xlu1 %190 }
 0x211   :  { %v1251_v25 = vpop.permute.xlu2 %821 }
 0x212   :  { %v824_v63 = vunpack.i.h.bf16 %v1251_v25  ;;  %v823_v41 = vunpack.i.l.bf16 %v1251_v25 }
 0x214   :  { %v187_v28 = vpop.permute.xlu0 %186 }
 0x215   :  { %v204_v35 = vsel %vm203_vm6, %v202_v33, %v187_v28  ;;  %v809_v28 = vunpack.i.h.bf16 %v1245_v14 }
 0x216   :  { %v206_v37 = vsel %vm205_vm7, %v204_v35, %v191_v55  ;;  %v808_v55 = vunpack.i.l.bf16 %v1245_v14 }
 0x217   :  { %390 = vmatmul.f32.vlgmr.msra.gmra.mxu2 %v206_v37 }
 0x219   :  { %v628_v40 = vpop.permute.xlu2 %627 }
 0x21a   :  { %v1258_v50 = vsel %vm193_vm1, %v560_v39, %v628_v40 }
 0x226   :  { %v797_v59 = vpop.permute.xlu0 %796 }
 0x227   :  { %v799_v26 = vunpack.i.h.bf16 %v797_v59  ;;  %v798_v3 = vunpack.i.l.bf16 %v797_v59 }
 0x229   :  { %v331_v29 = vsel %vm193_vm1, %v237_v27, %v799_v26  ;;  %v502_v31 = vsel %vm193_vm1, %v408_v17, %v798_v3 }
 0x22e   :  { %v812_v23 = vpop.permute.xlu0 %811 }
 0x22f   :  { %v814_v1 = vunpack.i.h.bf16 %v812_v23  ;;  %v813_v39 = vunpack.i.l.bf16 %v812_v23 }
 0x236   :  { %v802_v21 = vpop.permute.xlu1 %801 }
 0x237   :  { %v804_v46 = vunpack.i.h.bf16 %v802_v21  ;;  %v803_v38 = vunpack.i.l.bf16 %v802_v21 }
 0x239   :  { %v332_v32 = vsel %vm195_vm2, %v331_v29, %v804_v46  ;;  %v503_v33 = vsel %vm195_vm2, %v502_v31, %v803_v38 }
 0x23a   :  { %v333_v37 = vsel %vm197_vm3, %v332_v32, %v809_v28  ;;  %v504_v0 = vsel %vm197_vm3, %v503_v33, %v808_v55 }
 0x23b   :  { %v334_v44 = vsel %vm199_vm4, %v333_v37, %v814_v1  ;;  %v505_v45 = vsel %vm199_vm4, %v504_v0, %v813_v39 }
 0x23c   :  { %v640_v25 = vpop.permute.xlu2 %639 }
 0x23e   :  { %v827_v35 = vpop.permute.xlu0 %826 }
 0x23f   :  { %v829_v47 = vunpack.i.h.bf16 %v827_v35  ;;  %v828_v14 = vunpack.i.l.bf16 %v827_v35 }
 0x244   :  { %v652_v43 = vpop.permute.xlu2 %651 }
 0x246   :  { %v817_v10 = vpop.permute.xlu1 %816 }
 0x247   :  { %v819_v58 = vunpack.i.h.bf16 %v817_v10  ;;  %v818_v40 = vunpack.i.l.bf16 %v817_v10 }
 0x249   :  { %v335_v7 = vsel %vm201_vm5, %v334_v44, %v819_v58  ;;  %v506_v13 = vsel %vm201_vm5, %v505_v45, %v818_v40 }
 0x24a   :  { %v336_v4 = vsel %vm203_vm6, %v335_v7, %v824_v63  ;;  %v507_v15 = vsel %vm203_vm6, %v506_v13, %v823_v41 }
 0x24b   :  { %v337_v11 = vsel %vm205_vm7, %v336_v4, %v829_v47  ;;  %v508_v49 = vsel %vm205_vm7, %v507_v15, %v828_v14 }
 0x24c   :  { %v632_v51 = vpop.permute.xlu0 %631  ;;  %370 = vmatmul.f32.vlgmr.msra.gmra.mxu1 %v337_v11  ;;  %541 = vmatmul.f32.vlgmr.msra.gmra.mxu3 %v508_v49 }
 0x24d   :  { %v655_v5 = vsel %vm195_vm2, %v1258_v50, %v632_v51 }
 0x24e   :  { %v636_v52 = vpop.permute.xlu1 %635 }
 0x24f   :  { %v656_v42 = vsel %vm197_vm3, %v655_v5, %v636_v52 }
 0x250   :  { %v657_v54 = vsel %vm199_vm4, %v656_v42, %v640_v25 }
 0x254   :  { %v644_v19 = vpop.permute.xlu0 %643 }
 0x255   :  { %v658_v30 = vsel %vm201_vm5, %v657_v54, %v644_v19 }
 0x256   :  { %v648_v56 = vpop.permute.xlu1 %647 }
 0x257   :  { %v659_v24 = vsel %vm203_vm6, %v658_v30, %v648_v56 }
 0x258   :  { %v660_v34 = vsel %vm205_vm7, %v659_v24, %v652_v43 }
 0x259   :  { %693 = vmatmul.f32.vlgmr.msrb.gmra.mxu0 %v660_v34 }
 0x29a   :  { %v391_v57 = vpop.f32.mrf.mxu2 }
 0x2c9   :  { %v371_v36 = vpop.f32.mrf.mxu1 }
 0x2ca   :  { %v392_v62 = vadd.f32 %v391_v57, %v371_v36 }
 0x2cf   :  { %v542_v60 = vpop.f32.mrf.mxu3 }
 0x2d0   :  { %v545_v50 = vadd.f32 %v542_v60, %v392_v62 }
 0x2d6   :  { %v694_v61 = vpop.f32.mrf.mxu0 }
 0x2d7   :  { %v697_v48 = vadd.f32 %v694_v61, %v545_v50 }
 0x2d9   :  { %698 = vst [vmem:[#allocation8] sm:$0xff] %v697_v48 }
 0x2da   :  { %709 = dma.vmem_to_hbm [thread:$0]  %s705_s7, 128, %s707_s10, [#allocation4]  }
 0x2db   :  { %930 = dma.done.wait [#allocation4], 128  }
 0x2dc   :  { %931 = vsyncadd [#allocation4], 4294967168 }
 0x2dd   :  { %714 = vsyncpa [#allocation3], 1 }
 0x2de   :  { %715 = vsyncpa [#allocation6], 1 }
 0x2df   :  { %716 = vsyncpa [#allocation4], 1 }

</bundles_post_ra>
